<compile_context>
chip_gen: v7x
topology: tpu7x:2x2x1
jax: 0.10.0
libtpu: 0.0.40
codegen_flags: <defaults>
</compile_context>

<pallas_src>
import functools

import jax
import jax.numpy as jnp
from jax.experimental import pallas as pl
from jax.experimental.pallas import tpu as pltpu


def _masked_ce_kernel(masked_ref, logits_ref, targets_ref, partial_ref, *,
                      n_rows, n_masked, row_tile):
    """One row-tile: per-row CE, zero masked rows, emit tile partial sum."""
    logits = logits_ref[...].astype(jnp.float32)          # (TN, C) f32 compute
    tgt = targets_ref[...]                                 # (TN, 1) int32
    tn, c = logits.shape

    # numerically-stable log-sum-exp over classes
    row_max = jnp.max(logits, axis=-1, keepdims=True)                       # (TN,1)
    lse = row_max + jnp.log(jnp.sum(jnp.exp(logits - row_max),
                                    axis=-1, keepdims=True))                # (TN,1)

    # logit at the target class via one-hot select (no dynamic gather on TPU)
    col_ids = jax.lax.broadcasted_iota(jnp.int32, (tn, c), 1)
    onehot = col_ids == tgt
    correct = jnp.sum(jnp.where(onehot, logits, 0.0), axis=-1, keepdims=True)

    loss = lse - correct                                                    # (TN,1)

    # torch.isin(targets, masked_tokens): unrolled OR over SMEM scalars
    if n_masked == 0:
        is_masked = jnp.zeros_like(tgt, dtype=jnp.bool_)
    else:
        is_masked = tgt == masked_ref[0]
        for j in range(1, n_masked):
            is_masked = is_masked | (tgt == masked_ref[j])

    # mask masked-token rows AND padded rows of a partial last tile
    row_ids = (pl.program_id(0) * row_tile
               + jax.lax.broadcasted_iota(jnp.int32, (tn, 1), 0))
    keep = jnp.logical_and(row_ids < n_rows, jnp.logical_not(is_masked))
    loss = jnp.where(keep, loss, 0.0)

    # lane-dense per-tile partial sum (one block per grid step -> "parallel")
    partial_ref[...] = jnp.broadcast_to(jnp.sum(loss), (1, 1, 128))


def masked_cross_entropy(logits, targets, masked_tokens, *,
                         target_block_bytes=2 * 1024 * 1024):
    """logits: (N, C) any float dtype, targets: (N,) int, masked_tokens: (M,) int."""
    n, c = logits.shape
    itemsize = jnp.dtype(logits.dtype).itemsize

    # row tile sized so the logits block is ~target_block_bytes (multiple of 8)
    row_tile = max(8, (target_block_bytes // (c * itemsize)) // 8 * 8)
    row_tile = min(row_tile, ((n + 7) // 8) * 8)
    num_tiles = pl.cdiv(n, row_tile)

    tgt = targets.reshape(n, 1).astype(jnp.int32)
    mk = masked_tokens.reshape(-1).astype(jnp.int32)
    m = int(mk.shape[0])

    kernel = functools.partial(_masked_ce_kernel,
                               n_rows=n, n_masked=m, row_tile=row_tile)

    cost = pl.CostEstimate(
        flops=5 * n * c,
        transcendentals=n * c,
        bytes_accessed=n * c * itemsize + n * 4 + num_tiles * 128 * 4,
    )

    partials = pl.pallas_call(
        kernel,
        out_shape=jax.ShapeDtypeStruct((num_tiles, 1, 128), jnp.float32),
        grid_spec=pltpu.PrefetchScalarGridSpec(
            num_scalar_prefetch=1,                  # masked_tokens -> SMEM
            grid=(num_tiles,),
            in_specs=[
                pl.BlockSpec((row_tile, c), lambda i, mk_ref: (i, 0)),
                pl.BlockSpec((row_tile, 1), lambda i, mk_ref: (i, 0)),
            ],
            out_specs=pl.BlockSpec((1, 1, 128), lambda i, mk_ref: (i, 0, 0)),
        ),
        compiler_params=pltpu.CompilerParams(
            dimension_semantics=("parallel",),      # no carried state -> megacore OK
            vmem_limit_bytes=32 * 1024 * 1024,      # safe on v5e/v6e/v7x
        ),
        cost_estimate=cost,
    )(mk, logits, tgt)

    # final reduction + mean over ALL rows (masked rows count as 0) in XLA
    return jnp.sum(partials[:, 0, 0]) / jnp.float32(n)


def _reference(logits, targets, masked_tokens):
    logits = logits.astype(jnp.float32)
    lse = jax.scipy.special.logsumexp(logits, axis=-1)
    correct = jnp.take_along_axis(logits, targets[:, None], axis=-1)[:, 0]
    loss = lse - correct
    is_masked = jnp.isin(targets, masked_tokens)
    loss = jnp.where(is_masked, 0.0, loss)
    return jnp.mean(loss)


if __name__ == "__main__":
    key = jax.random.PRNGKey(0)
    k1, k2 = jax.random.split(key)

    N, C = 16, 32                                        # batch rows, num classes
    masked_tokens = jnp.array([0, 3, 7], dtype=jnp.int32)  # module __init__ buffer

    logits = jax.random.normal(k1, (N, C), dtype=jnp.float32)
    targets = jax.random.randint(k2, (N,), 0, C, dtype=jnp.int32)

    out = masked_cross_entropy(logits, targets, masked_tokens)
    out = jax.block_until_ready(out)

    ref = _reference(logits, targets, masked_tokens)
    assert jnp.allclose(out, ref, atol=1e-5, rtol=1e-5), (out, ref)

    # also exercise the non-multiple-of-tile / bf16 input path
    N2 = 13
    logits2 = jax.random.normal(k1, (N2, C), dtype=jnp.bfloat16)
    targets2 = jax.random.randint(k2, (N2,), 0, C, dtype=jnp.int32)
    out2 = jax.block_until_ready(
        masked_cross_entropy(logits2, targets2, masked_tokens))
    ref2 = _reference(logits2, targets2, masked_tokens)
    assert jnp.allclose(out2, ref2, atol=2e-2, rtol=2e-2), (out2, ref2)

    print("KERNEL_OK")
</pallas_src>

<mosaic_0001>
module attributes {stable_mosaic.version = 11 : i64} {
  func.func @_masked_ce_kernel(%arg0: i32, %arg1: memref<3xi32, #tpu.memory_space<smem>>, %arg2: memref<16x32xf32, #tpu.memory_space<vmem>>, %arg3: memref<16x1xi32, #tpu.memory_space<vmem>>, %arg4: memref<1x1x128xf32, #tpu.memory_space<vmem>>) attributes {dimension_semantics = [#tpu.dimension_semantics<parallel>], iteration_bounds = array<i64: 1>, scalar_prefetch = 1 : i64, scratch_operands = 0 : i64, tpu.core_type = #tpu.core_type<tc>, window_params = [{transform_indices = @transform_0, window_bounds = array<i64: 16, 32>}, {transform_indices = @transform_1, window_bounds = array<i64: 16, 1>}, {transform_indices = @transform_2, window_bounds = array<i64: 1, 1, 128>}]} {
    %c0 = arith.constant 0 : index
    %c0_0 = arith.constant 0 : index
    %0 = vector.load %arg2[%c0, %c0_0] : memref<16x32xf32, #tpu.memory_space<vmem>>, vector<16x32xf32>
    %c0_1 = arith.constant 0 : index
    %c0_2 = arith.constant 0 : index
    %1 = vector.load %arg3[%c0_1, %c0_2] : memref<16x1xi32, #tpu.memory_space<vmem>>, vector<16x1xi32>
    %cst = arith.constant dense<0xFF800000> : vector<16xf32>
    %2 = vector.multi_reduction <maximumf>, %0, %cst [1] : vector<16x32xf32> to vector<16xf32>
    %3 = vector.shape_cast %2 : vector<16xf32> to vector<16x1xf32>
    %4 = vector.broadcast %3 : vector<16x1xf32> to vector<16x32xf32>
    %5 = arith.subf %0, %4 : vector<16x32xf32>
    %6 = math.exp %5 : vector<16x32xf32>
    %cst_3 = arith.constant dense<0.000000e+00> : vector<16xf32>
    %7 = vector.multi_reduction <add>, %6, %cst_3 [1] : vector<16x32xf32> to vector<16xf32>
    %8 = vector.shape_cast %7 : vector<16xf32> to vector<16x1xf32>
    %9 = math.log %8 : vector<16x1xf32>
    %10 = arith.addf %3, %9 : vector<16x1xf32>
    %11 = tpu.iota {dimensions = array<i32: 1>} : vector<16x32xi32>
    %12 = vector.broadcast %1 : vector<16x1xi32> to vector<16x32xi32>
    %13 = arith.cmpi eq, %11, %12 : vector<16x32xi32>
    %cst_4 = arith.constant 0.000000e+00 : f32
    %14 = vector.broadcast %cst_4 : f32 to vector<16x32xf32>
    %15 = arith.select %13, %0, %14 : vector<16x32xi1>, vector<16x32xf32>
    %cst_5 = arith.constant dense<0.000000e+00> : vector<16xf32>
    %16 = vector.multi_reduction <add>, %15, %cst_5 [1] : vector<16x32xf32> to vector<16xf32>
    %17 = vector.shape_cast %16 : vector<16xf32> to vector<16x1xf32>
    %18 = arith.subf %10, %17 : vector<16x1xf32>
    %c0_6 = arith.constant 0 : index
    %19 = memref.load %arg1[%c0_6] : memref<3xi32, #tpu.memory_space<smem>>
    %20 = vector.broadcast %19 : i32 to vector<16x1xi32>
    %21 = arith.cmpi eq, %1, %20 : vector<16x1xi32>
    %c1 = arith.constant 1 : index
    %22 = memref.load %arg1[%c1] : memref<3xi32, #tpu.memory_space<smem>>
    %23 = vector.broadcast %22 : i32 to vector<16x1xi32>
    %24 = arith.cmpi eq, %1, %23 : vector<16x1xi32>
    %25 = arith.ori %21, %24 : vector<16x1xi1>
    %c2 = arith.constant 2 : index
    %26 = memref.load %arg1[%c2] : memref<3xi32, #tpu.memory_space<smem>>
    %27 = vector.broadcast %26 : i32 to vector<16x1xi32>
    %28 = arith.cmpi eq, %1, %27 : vector<16x1xi32>
    %29 = arith.ori %25, %28 : vector<16x1xi1>
    %c16_i32 = arith.constant 16 : i32
    %30 = arith.muli %arg0, %c16_i32 : i32
    %31 = tpu.iota {dimensions = array<i32: 0>} : vector<16x1xi32>
    %32 = vector.broadcast %30 : i32 to vector<16x1xi32>
    %33 = arith.addi %32, %31 : vector<16x1xi32>
    %c16_i32_7 = arith.constant 16 : i32
    %34 = vector.broadcast %c16_i32_7 : i32 to vector<16x1xi32>
    %35 = arith.cmpi slt, %33, %34 : vector<16x1xi32>
    %cst_8 = arith.constant dense<true> : vector<16x1xi1>
    %36 = arith.xori %29, %cst_8 : vector<16x1xi1>
    %37 = arith.andi %35, %36 : vector<16x1xi1>
    %cst_9 = arith.constant 0.000000e+00 : f32
    %38 = vector.broadcast %cst_9 : f32 to vector<16x1xf32>
    %39 = arith.select %37, %18, %38 : vector<16x1xi1>, vector<16x1xf32>
    %40 = vector.shape_cast %39 : vector<16x1xf32> to vector<1x16x1xf32>
    %cst_10 = arith.constant dense<0.000000e+00> : vector<1xf32>
    %41 = vector.multi_reduction <add>, %40, %cst_10 [1, 2] : vector<1x16x1xf32> to vector<1xf32>
    %42 = vector.shape_cast %41 : vector<1xf32> to vector<1x1x1xf32>
    %43 = vector.extract %42[0, 0, 0] : f32 from vector<1x1x1xf32>
    %44 = vector.broadcast %43 : f32 to vector<1x1x128xf32>
    %c0_11 = arith.constant 0 : index
    %c0_12 = arith.constant 0 : index
    %c0_13 = arith.constant 0 : index
    %45 = vector.load %arg4[%c0_11, %c0_12, %c0_13] : memref<1x1x128xf32, #tpu.memory_space<vmem>>, vector<1x1x128xf32>
    tpu.vector_store %arg4[%c0_11, %c0_12, %c0_13], %44 {strides = array<i32>} : memref<1x1x128xf32, #tpu.memory_space<vmem>>, vector<1x1x128xf32>,
    return
  }
  func.func @transform_0(%arg0: i32, %arg1: memref<3xi32, #tpu.memory_space<smem>>) -> (i32, i32) {
    %c0_i32 = arith.constant 0 : i32
    %c0_i32_0 = arith.constant 0 : i32
    return %arg0, %c0_i32 : i32, i32
  }
  func.func @transform_1(%arg0: i32, %arg1: memref<3xi32, #tpu.memory_space<smem>>) -> (i32, i32) {
    %c0_i32 = arith.constant 0 : i32
    %c0_i32_0 = arith.constant 0 : i32
    return %arg0, %c0_i32 : i32, i32
  }
  func.func @transform_2(%arg0: i32, %arg1: memref<3xi32, #tpu.memory_space<smem>>) -> (i32, i32, i32) {
    %c0_i32 = arith.constant 0 : i32
    %c0_i32_0 = arith.constant 0 : i32
    %c0_i32_1 = arith.constant 0 : i32
    return %arg0, %c0_i32, %c0_i32_0 : i32, i32, i32
  }
}

</mosaic_0001>

<bundles_post_ra>
// kernel: tpu_custom_call.1
= control target key start
LH: loop header
LB: loop body
LE: loop exit
PB: predicated region body
PF: predicated region fallthrough
CT: control target
= control target key end

     0   :  { %s247_s0 = inlined_call_operand.vmem [shape: s32[3], index: 0, kind: input, shape index: {}]   ;;  %s248_s1 = inlined_call_operand.vmem [shape: f32[16,32], index: 1, kind: input, shape index: {}]   ;;  %s249_s2 = inlined_call_operand.vmem [shape: s32[16,1], index: 2, kind: input, shape index: {}]   ;;  %s250_s3 = inlined_call_operand.hbm [shape: f32[1,1,128], index: 3, kind: output, shape index: {}]  }
   0x1   :  { %s8_s14 = sshll.u32 %s247_s0, 4  ;;  %s9_s14 = int_to_ptr.vmem [resolvable:$true] %s8_s14 }
   0x2   :  { %s146_s15 = scalar_lea.vmem %s9_s14, 16  ;;  %p151_p1 = scmp.lt.s32.totalorder %s9_s14, %s9_s14 }
   0x3   :  { %p147_p0 = scmp.ne.s32.totalorder %s9_s14, %s146_s15  ;;  %p152_p2 = scmp.lt.s32.totalorder %s146_s15, %s146_s15 }
   0x5   :  { %p153_p3 = por %p152_p2, %p151_p1 }
   0x7   :  { %p154_p4 = pnand %p153_p3, %p147_p0 }
   0x9   :  { %157 = shalt.err (!%p154_p4)  }
   0xa   :  { %s184_s16 = smov [#allocation3]  }
   0xb   :  { %11 = dma.vmem_to_smem %s9_s14, 16, %s184_s16, [#allocation2] }
   0xc   :  { %180 = dma.done.wait [#allocation2], 16 }
   0xd   :  { %181 = vsyncadd [#allocation2], 4294967280 }
   0xe   :  { %13 = sfence }
   0xf   :  { %v19_v0 = vld [vmem:[%s248_s1] sm:$0xff]  ;;  %vm23_vm0 = vcmask 261120   ;;  %v20_v1 = vld [vmem:[%s248_s1 + $0x8] sm:$0xff]  ;;  %v185_v4 = vmov 0  }
  0x10   :  { %v21_v2 = vld [vmem:[%s249_s2] sm:$0xff]  ;;  %v24_v3 = vsel %vm23_vm0, %v19_v0, -inf  ;;  %136 = vset.pattern.permute.xlu1 %v185_v4  ;;  %137 = vset.pattern.permute.xlu0 %v185_v4 }
  0x11   :  { %14 = vsyncpa [#allocation5], 0  ;;  %25 = vmax.xlane.f32.xlu0 %v24_v3  ;;  %51 = vperm.xlu1 %136, %v21_v2   ;;  %v27_v5 = vsel %vm23_vm0, %v20_v1, -inf  ;;  %v22_v6 = vld [vmem:[%s249_s2 + $0x8] sm:$0xff]  ;;  %v48_v11 = vlaneseq  ;;  %s68_s1 = sld [smem:[#allocation3]]  ;;  %s128_s2 = sld [smem:[#allocation3 + $0x1]] }
  0x12   :  { %s129_s24 = sld [smem:[#allocation3 + $0x2]]  ;;  %vm186_vm13 = vmmov 1   ;;  %s187_s25 = smov [#allocation4]  }
  0x13   :  { %v49_v15 = vand.u32 127, %v48_v11  ;;  %s120_s26 = sshll.u32 %s187_s25, 4  ;;  %s121_s26 = int_to_ptr.vmem [resolvable:$true] %s120_s26 }
  0x14   :  { %s158_s28 = scalar_lea.vmem %s121_s26, 16  ;;  %s162_s29 = scalar_lea.vmem %s121_s26, 32 }
  0x15   :  { %28 = vmax.xlane.f32.xlu0 %v27_v5  ;;  %54 = vperm.xlu1 %136, %v22_v6   ;;  %p159_p5 = scmp.ne.s32.totalorder %s121_s26, %s158_s28  ;;  %p163_p6 = scmp.lt.s32.totalorder %s121_s26, %s121_s26 }
  0x16   :  { %p164_p7 = scmp.lt.s32.totalorder %s162_s29, %s158_s28 }
  0x17   :  { %v69_v27 = vstv %s68_s1  ;;  %v73_v28 = vstv %s128_s2 }
  0x18   :  { %vm70_vm3 = vcmp.eq.s32.totalorder %v21_v2, %v69_v27  ;;  %vm74_vm4 = vcmp.eq.s32.totalorder %v21_v2, %v73_v28  ;;  %v79_v29 = vstv %s129_s24  ;;  %vm229_vm5 = vcmp.eq.s32.totalorder %v22_v6, %v69_v27  ;;  %p165_p8 = por %p164_p7, %p163_p6 }
  0x19   :  { %vm75_vm6 = vcmp.eq.s32.totalorder %v22_v6, %v73_v28  ;;  %vm76_vm7 = vmor %vm70_vm3, %vm74_vm4  ;;  %vm80_vm8 = vcmp.eq.s32.totalorder %v21_v2, %v79_v29  ;;  %vm81_vm10 = vcmp.eq.s32.totalorder %v22_v6, %v79_v29 }
  0x1a   :  { %vm77_vm9 = vmor %vm229_vm5, %vm75_vm6  ;;  %p166_p9 = pnand %p165_p8, %p159_p5 }
  0x1b   :  { %vm82_vm11 = vmor %vm76_vm7, %vm80_vm8 }
  0x1c   :  { %vm83_vm12 = vmor %vm77_vm9, %vm81_vm10 }
  0x1d   :  { %vm93_vm14 = vmxor %vm82_vm11, %vm186_vm13 }
  0x1e   :  { %vm94_vm15 = vmxor %vm83_vm12, %vm186_vm13 }
  0x90   :  { %v52_v14 = vpop.permute.xlu1 %51 }
  0x91   :  { %vm56_vm1 = vcmp.eq.s32.totalorder %v49_v15, %v52_v14 }
  0x92   :  { %v58_v18 = vsel %vm56_vm1, %v19_v0, 0.0 }
  0x93   :  { %v60_v20 = vsel %vm23_vm0, %v58_v18, 0.0 }
  0x94   :  { %v55_v16 = vpop.permute.xlu1 %54 }
  0x95   :  { %vm57_vm2 = vcmp.eq.s32.totalorder %v49_v15, %v55_v16 }
  0x96   :  { %v59_v22 = vsel %vm57_vm2, %v20_v1, 0.0 }
  0x97   :  { %v63_v24 = vsel %vm23_vm0, %v59_v22, 0.0 }
  0x9e   :  { %v26_v7 = vpop.xlane.xlu0 %25 }
  0x9f   :  { %v30_v8 = vsub.f32 %v19_v0, %v26_v7 }
  0xa1   :  { %v32_v9 = vmul.f32 1.442695, %v30_v8 }
  0xa2   :  { %v29_v10 = vpop.xlane.xlu0 %28 }
  0xa3   :  { %138 = vpow2.f32 %v32_v9  ;;  %v31_v12 = vsub.f32 %v20_v1, %v29_v10 }
  0xa5   :  { %v34_v13 = vmul.f32 1.442695, %v31_v12 }
  0xa7   :  { %140 = vpow2.f32 %v34_v13 }
  0xad   :  { %v139_v17 = vpop.eup %138 }
  0xae   :  { %v36_v19 = vsel %vm23_vm0, %v139_v17, 0.0 }
  0xaf   :  { %37 = vadd.xlane.f32.xlu0 %v36_v19 }
  0xb1   :  { %v141_v21 = vpop.eup %140 }
  0xb2   :  { %v39_v23 = vsel %vm23_vm0, %v141_v21, 0.0  ;;  %vm99_vm0 = vcmask 7168  }
  0xb3   :  { %40 = vadd.xlane.f32.xlu1 %v39_v23  ;;  %61 = vadd.xlane.f32.xlu0 %v60_v20 }
  0xb7   :  { %64 = vadd.xlane.f32.xlu0 %v63_v24 }
 0x13c   :  { %v38_v25 = vpop.xlane.xlu0 %37 }
 0x13d   :  { %142 = vlog2.f32 %v38_v25 }
 0x140   :  { %v41_v26 = vpop.xlane.xlu1 %40  ;;  %v62_v33 = vpop.xlane.xlu0 %61 }
 0x141   :  { %144 = vlog2.f32 %v41_v26 }
 0x144   :  { %v65_v39 = vpop.xlane.xlu0 %64 }
 0x147   :  { %v143_v31 = vpop.eup %142 }
 0x148   :  { %v43_v32 = vmul.f32 0.6931472, %v143_v31 }
 0x14a   :  { %v46_v34 = vadd.f32 %v43_v32, %v26_v7 }
 0x14b   :  { %v145_v35 = vpop.eup %144 }
 0x14c   :  { %v45_v36 = vmul.f32 0.6931472, %v145_v35  ;;  %v66_v37 = vsub.f32 %v46_v34, %v62_v33 }
 0x14e   :  { %v47_v38 = vadd.f32 %v45_v36, %v29_v10  ;;  %v97_v40 = vsel %vm93_vm14, %v66_v37, 0.0 }
 0x14f   :  { %v100_v43 = vsel %vm99_vm0, %v97_v40, 0.0 }
 0x150   :  { %v67_v41 = vsub.f32 %v47_v38, %v65_v39 }
 0x152   :  { %v98_v42 = vsel %vm94_vm15, %v67_v41, 0.0 }
 0x153   :  { %v101_v44 = vsel %vm99_vm0, %v98_v42, 0.0 }
 0x154   :  { %v102_v45 = vadd.f32 %v101_v44, %v100_v43 }
 0x156   :  { %103 = vadd.xlane.f32.xlu0 %v102_v45 }
 0x1e3   :  { %v104_v46 = vpop.xlane.xlu0 %103 }
 0x1e4   :  { %v105_v47 = vrot.slane %v104_v46, 4 }
 0x1e6   :  { %v106_v48 = vadd.f32 %v105_v47, %v104_v46 }
 0x1e8   :  { %v107_v49 = vrot.slane %v106_v48, 2 }
 0x1ea   :  { %v108_v50 = vadd.f32 %v107_v49, %v106_v48 }
 0x1ec   :  { %v109_v51 = vrot.slane %v108_v50, 1 }
 0x1ee   :  { %v110_v52 = vadd.f32 %v109_v51, %v108_v50 }
 0x1f0   :  { %130 = vpush %v110_v52 }
 0x221   :  { %s131_s27 = spop %130 }
 0x222   :  { %v112_v53 = vstv %s131_s27 }
 0x223   :  { %113 = vst [vmem:[#allocation4] sm:$0x1] %v112_v53 }
 0x224   :  { %169 = shalt.err (!%p166_p9)
}
 0x225   :  { %s170_s5 = scalar_lea.hbm %s250_s3, 16 }
 0x226   :  { %p171_p10 = scmp.ne.s32.totalorder %s250_s3, %s170_s5  ;;  %p174_p11 = scmp.lt.u32.totalorder %s170_s5, %s250_s3 }
 0x228   :  { %p176_p12 = pnand %p174_p11, %p171_p10 }
 0x22a   :  { %179 = shalt.err (!%p176_p12)
}
 0x22b   :  { %123 = dma.vmem_to_hbm [thread:$0]  %s121_s26, 16, %s250_s3, [#allocation5]  }
 0x22c   :  { %182 = dma.done.wait [#allocation5], 16  }
 0x22d   :  { %183 = vsyncadd [#allocation5], 4294967280 }
 0x22e   :  { %127 = vsyncpa [#allocation5], 1 }

</bundles_post_ra>
